<compile_context>
chip_gen: v5e
topology: v5e:2x2
jax: 0.10.0
libtpu: 0.0.40
codegen_flags: <defaults>
</compile_context>

<pallas_src>
import functools

import jax
import jax.numpy as jnp
from jax.experimental import pallas as pl
from jax.experimental.pallas import tpu as pltpu


def _summ_kernel(a_ref, o_ref, acc_ref, *, rows):
    # grid = (lane_chunks [parallel], seq_blocks [arbitrary/sequential]).
    seq_idx = pl.program_id(1)

    # Accumulator is per lane-chunk; reset at the start of each chunk's
    # sequential sweep (keyed on the N-axis program id).
    @pl.when(seq_idx == 0)
    def _():
        acc_ref[...] = jnp.zeros_like(acc_ref)

    def body(r, carry):
        # Exclusive prefix: emit the running sum BEFORE adding row r.
        o_ref[r] = acc_ref[...].astype(o_ref.dtype)
        acc_ref[...] = acc_ref[...] + a_ref[r].astype(acc_ref.dtype)
        return carry

    jax.lax.fori_loop(0, rows, body, 0, unroll=min(rows, 8))


def _choose_lane_tile(s, itemsize):
    """Pick the lane-chunk height TS.

    TS must be a multiple of 8 (or equal to S) to satisfy the (8,128) block
    rule.  When S is comfortably splittable we aim for >=2 chunks so the
    parallel grid axis can be sharded across TensorCores (v7x megacore), while
    keeping each (TS, 128) row chunk / accumulator at <= ~2 MiB.
    """
    if s % 8 != 0 or s < 16:
        return s
    ts = max(8, ((s // 2) + 7) // 8 * 8)          # ~half of S, rounded to 8
    max_ts = max(8, ((2 * 1024 * 1024) // (128 * itemsize)) // 8 * 8)
    return min(ts, max_ts)


@jax.jit
def summ(a):
    """Exclusive cumsum along axis 0; same shape/dtype as `a`."""
    orig_shape = a.shape
    orig_dtype = a.dtype
    n = orig_shape[0]
    itemsize = jnp.dtype(orig_dtype).itemsize

    # Flatten trailing dims into a lane-dense payload of width L.
    flat = a.reshape(n, -1)
    l = flat.shape[1]
    l_pad = ((l + 127) // 128) * 128
    if l_pad != l:
        # Only pay the pad pass when L is not already lane-aligned.
        flat = jnp.pad(flat, ((0, 0), (0, l_pad - l)))
    s = l_pad // 128
    x = flat.reshape(n, s, 128)

    # Accumulate in f32 for floating inputs (numerically safer), natively for
    # integer inputs.
    if jnp.issubdtype(orig_dtype, jnp.floating):
        acc_dtype = jnp.float32
    else:
        acc_dtype = orig_dtype

    # Tile sizes: lane chunk TS (parallel axis) and sequence rows per block Tn.
    ts = _choose_lane_tile(s, itemsize)
    block_row_bytes = ts * 128 * itemsize
    target_block_bytes = 2 * 1024 * 1024
    tn = max(1, min(n, target_block_bytes // block_row_bytes))

    grid = (pl.cdiv(s, ts), pl.cdiv(n, tn))

    out = pl.pallas_call(
        functools.partial(_summ_kernel, rows=tn),
        out_shape=jax.ShapeDtypeStruct((n, s, 128), orig_dtype),
        grid=grid,
        in_specs=[pl.BlockSpec((tn, ts, 128), lambda c, i: (i, c, 0))],
        out_specs=pl.BlockSpec((tn, ts, 128), lambda c, i: (i, c, 0)),
        scratch_shapes=[pltpu.VMEM((ts, 128), acc_dtype)],
        compiler_params=pltpu.CompilerParams(
            # Lane chunks are independent -> parallel (shards across TCs on
            # v7x); sequence axis carries the accumulator -> arbitrary.
            dimension_semantics=("parallel", "arbitrary"),
            # Headroom-sized for v7x's 64 MiB physical VMEM; also lifts the
            # 16/32 MiB scoped defaults on v5e/v6e.
            vmem_limit_bytes=48 * 1024 * 1024,
        ),
    )(x)

    out = out.reshape(n, l_pad)
    if l_pad != l:
        out = out[:, :l]
    return out.reshape(orig_shape)


def _reference(a):
    # Pure-JAX mirror of the PyTorch loop.
    ans = jnp.zeros_like(a)
    for i in range(1, a.shape[0]):
        ans = ans.at[i].set(ans[i - 1] + a[i - 1])
    return ans


if __name__ == "__main__":
    key = jax.random.PRNGKey(0)
    # Small NCHW-style input: leading axis is the dim the loop runs over.
    x = jax.random.normal(key, (8, 4, 16, 16), dtype=jnp.float32)

    y = summ(x)
    jax.block_until_ready(y)

    y_ref = _reference(x)
    assert y.shape == x.shape and y.dtype == x.dtype
    assert jnp.allclose(y, y_ref, atol=1e-5, rtol=1e-5), "mismatch vs reference"

    print("KERNEL_OK")
</pallas_src>

<mosaic_0001>
module attributes {stable_mosaic.version = 11 : i64} {
  func.func @_summ_kernel(%arg0: i32, %arg1: i32, %arg2: memref<8x8x128xf32, #tpu.memory_space<vmem>>, %arg3: memref<8x8x128xf32, #tpu.memory_space<vmem>>, %arg4: memref<8x128xf32, #tpu.memory_space<vmem>>) attributes {dimension_semantics = [#tpu.dimension_semantics<parallel>, #tpu.dimension_semantics<arbitrary>], iteration_bounds = array<i64: 1, 1>, scalar_prefetch = 0 : i64, scratch_operands = 1 : i64, tpu.core_type = #tpu.core_type<tc>, window_params = [{transform_indices = @transform_0, window_bounds = array<i64: 8, 8, 128>}, {transform_indices = @transform_1, window_bounds = array<i64: 8, 8, 128>}]} {
    %c0_i32 = arith.constant 0 : i32
    %0 = arith.cmpi eq, %arg1, %c0_i32 : i32
    %1 = arith.extui %0 : i1 to i32
    %c0_i32_0 = arith.constant 0 : i32
    %2 = arith.cmpi ne, %1, %c0_i32_0 : i32
    scf.if %2 {
      %cst = arith.constant 0.000000e+00 : f32
      %91 = vector.broadcast %cst : f32 to vector<8x128xf32>
      %c0_81 = arith.constant 0 : index
      %c0_82 = arith.constant 0 : index
      %92 = vector.load %arg4[%c0_81, %c0_82] : memref<8x128xf32, #tpu.memory_space<vmem>>, vector<8x128xf32>
      tpu.vector_store %arg4[%c0_81, %c0_82], %91 {strides = array<i32>} : memref<8x128xf32, #tpu.memory_space<vmem>>, vector<8x128xf32>,
    } else {
    }
    %c0_i32_1 = arith.constant 0 : i32
    %c0 = arith.constant 0 : index
    %c0_2 = arith.constant 0 : index
    %3 = vector.load %arg4[%c0, %c0_2] : memref<8x128xf32, #tpu.memory_space<vmem>>, vector<8x128xf32>
    %4 = arith.index_cast %c0_i32_1 : i32 to index
    %c0_3 = arith.constant 0 : index
    %c0_4 = arith.constant 0 : index
    %5 = vector.load %arg3[%4, %c0_3, %c0_4] : memref<8x8x128xf32, #tpu.memory_space<vmem>>, vector<1x8x128xf32>
    %6 = vector.shape_cast %5 : vector<1x8x128xf32> to vector<8x128xf32>
    %7 = vector.shape_cast %3 : vector<8x128xf32> to vector<1x8x128xf32>
    tpu.vector_store %arg3[%4, %c0_3, %c0_4], %7 {strides = array<i32>} : memref<8x8x128xf32, #tpu.memory_space<vmem>>, vector<1x8x128xf32>,
    %c0_5 = arith.constant 0 : index
    %c0_6 = arith.constant 0 : index
    %8 = vector.load %arg4[%c0_5, %c0_6] : memref<8x128xf32, #tpu.memory_space<vmem>>, vector<8x128xf32>
    %9 = arith.index_cast %c0_i32_1 : i32 to index
    %c0_7 = arith.constant 0 : index
    %c0_8 = arith.constant 0 : index
    %10 = vector.load %arg2[%9, %c0_7, %c0_8] : memref<8x8x128xf32, #tpu.memory_space<vmem>>, vector<1x8x128xf32>
    %11 = vector.shape_cast %10 : vector<1x8x128xf32> to vector<8x128xf32>
    %12 = arith.addf %8, %11 : vector<8x128xf32>
    %c0_9 = arith.constant 0 : index
    %c0_10 = arith.constant 0 : index
    %13 = vector.load %arg4[%c0_9, %c0_10] : memref<8x128xf32, #tpu.memory_space<vmem>>, vector<8x128xf32>
    tpu.vector_store %arg4[%c0_9, %c0_10], %12 {strides = array<i32>} : memref<8x128xf32, #tpu.memory_space<vmem>>, vector<8x128xf32>,
    %c1_i32 = arith.constant 1 : i32
    %c0_11 = arith.constant 0 : index
    %c0_12 = arith.constant 0 : index
    %14 = vector.load %arg4[%c0_11, %c0_12] : memref<8x128xf32, #tpu.memory_space<vmem>>, vector<8x128xf32>
    %15 = arith.index_cast %c1_i32 : i32 to index
    %c0_13 = arith.constant 0 : index
    %c0_14 = arith.constant 0 : index
    %16 = vector.load %arg3[%15, %c0_13, %c0_14] : memref<8x8x128xf32, #tpu.memory_space<vmem>>, vector<1x8x128xf32>
    %17 = vector.shape_cast %16 : vector<1x8x128xf32> to vector<8x128xf32>
    %18 = vector.shape_cast %14 : vector<8x128xf32> to vector<1x8x128xf32>
    tpu.vector_store %arg3[%15, %c0_13, %c0_14], %18 {strides = array<i32>} : memref<8x8x128xf32, #tpu.memory_space<vmem>>, vector<1x8x128xf32>,
    %c0_15 = arith.constant 0 : index
    %c0_16 = arith.constant 0 : index
    %19 = vector.load %arg4[%c0_15, %c0_16] : memref<8x128xf32, #tpu.memory_space<vmem>>, vector<8x128xf32>
    %20 = arith.index_cast %c1_i32 : i32 to index
    %c0_17 = arith.constant 0 : index
    %c0_18 = arith.constant 0 : index
    %21 = vector.load %arg2[%20, %c0_17, %c0_18] : memref<8x8x128xf32, #tpu.memory_space<vmem>>, vector<1x8x128xf32>
    %22 = vector.shape_cast %21 : vector<1x8x128xf32> to vector<8x128xf32>
    %23 = arith.addf %19, %22 : vector<8x128xf32>
    %c0_19 = arith.constant 0 : index
    %c0_20 = arith.constant 0 : index
    %24 = vector.load %arg4[%c0_19, %c0_20] : memref<8x128xf32, #tpu.memory_space<vmem>>, vector<8x128xf32>
    tpu.vector_store %arg4[%c0_19, %c0_20], %23 {strides = array<i32>} : memref<8x128xf32, #tpu.memory_space<vmem>>, vector<8x128xf32>,
    %c2_i32 = arith.constant 2 : i32
    %c0_21 = arith.constant 0 : index
    %c0_22 = arith.constant 0 : index
    %25 = vector.load %arg4[%c0_21, %c0_22] : memref<8x128xf32, #tpu.memory_space<vmem>>, vector<8x128xf32>
    %26 = arith.index_cast %c2_i32 : i32 to index
    %c0_23 = arith.constant 0 : index
    %c0_24 = arith.constant 0 : index
    %27 = vector.load %arg3[%26, %c0_23, %c0_24] : memref<8x8x128xf32, #tpu.memory_space<vmem>>, vector<1x8x128xf32>
    %28 = vector.shape_cast %27 : vector<1x8x128xf32> to vector<8x128xf32>
    %29 = vector.shape_cast %25 : vector<8x128xf32> to vector<1x8x128xf32>
    tpu.vector_store %arg3[%26, %c0_23, %c0_24], %29 {strides = array<i32>} : memref<8x8x128xf32, #tpu.memory_space<vmem>>, vector<1x8x128xf32>,
    %c0_25 = arith.constant 0 : index
    %c0_26 = arith.constant 0 : index
    %30 = vector.load %arg4[%c0_25, %c0_26] : memref<8x128xf32, #tpu.memory_space<vmem>>, vector<8x128xf32>
    %31 = arith.index_cast %c2_i32 : i32 to index
    %c0_27 = arith.constant 0 : index
    %c0_28 = arith.constant 0 : index
    %32 = vector.load %arg2[%31, %c0_27, %c0_28] : memref<8x8x128xf32, #tpu.memory_space<vmem>>, vector<1x8x128xf32>
    %33 = vector.shape_cast %32 : vector<1x8x128xf32> to vector<8x128xf32>
    %34 = arith.addf %30, %33 : vector<8x128xf32>
    %c0_29 = arith.constant 0 : index
    %c0_30 = arith.constant 0 : index
    %35 = vector.load %arg4[%c0_29, %c0_30] : memref<8x128xf32, #tpu.memory_space<vmem>>, vector<8x128xf32>
    tpu.vector_store %arg4[%c0_29, %c0_30], %34 {strides = array<i32>} : memref<8x128xf32, #tpu.memory_space<vmem>>, vector<8x128xf32>,
    %c3_i32 = arith.constant 3 : i32
    %c0_31 = arith.constant 0 : index
    %c0_32 = arith.constant 0 : index
    %36 = vector.load %arg4[%c0_31, %c0_32] : memref<8x128xf32, #tpu.memory_space<vmem>>, vector<8x128xf32>
    %37 = arith.index_cast %c3_i32 : i32 to index
    %c0_33 = arith.constant 0 : index
    %c0_34 = arith.constant 0 : index
    %38 = vector.load %arg3[%37, %c0_33, %c0_34] : memref<8x8x128xf32, #tpu.memory_space<vmem>>, vector<1x8x128xf32>
    %39 = vector.shape_cast %38 : vector<1x8x128xf32> to vector<8x128xf32>
    %40 = vector.shape_cast %36 : vector<8x128xf32> to vector<1x8x128xf32>
    tpu.vector_store %arg3[%37, %c0_33, %c0_34], %40 {strides = array<i32>} : memref<8x8x128xf32, #tpu.memory_space<vmem>>, vector<1x8x128xf32>,
    %c0_35 = arith.constant 0 : index
    %c0_36 = arith.constant 0 : index
    %41 = vector.load %arg4[%c0_35, %c0_36] : memref<8x128xf32, #tpu.memory_space<vmem>>, vector<8x128xf32>
    %42 = arith.index_cast %c3_i32 : i32 to index
    %c0_37 = arith.constant 0 : index
    %c0_38 = arith.constant 0 : index
    %43 = vector.load %arg2[%42, %c0_37, %c0_38] : memref<8x8x128xf32, #tpu.memory_space<vmem>>, vector<1x8x128xf32>
    %44 = vector.shape_cast %43 : vector<1x8x128xf32> to vector<8x128xf32>
    %45 = arith.addf %41, %44 : vector<8x128xf32>
    %c0_39 = arith.constant 0 : index
    %c0_40 = arith.constant 0 : index
    %46 = vector.load %arg4[%c0_39, %c0_40] : memref<8x128xf32, #tpu.memory_space<vmem>>, vector<8x128xf32>
    tpu.vector_store %arg4[%c0_39, %c0_40], %45 {strides = array<i32>} : memref<8x128xf32, #tpu.memory_space<vmem>>, vector<8x128xf32>,
    %c4_i32 = arith.constant 4 : i32
    %c0_41 = arith.constant 0 : index
    %c0_42 = arith.constant 0 : index
    %47 = vector.load %arg4[%c0_41, %c0_42] : memref<8x128xf32, #tpu.memory_space<vmem>>, vector<8x128xf32>
    %48 = arith.index_cast %c4_i32 : i32 to index
    %c0_43 = arith.constant 0 : index
    %c0_44 = arith.constant 0 : index
    %49 = vector.load %arg3[%48, %c0_43, %c0_44] : memref<8x8x128xf32, #tpu.memory_space<vmem>>, vector<1x8x128xf32>
    %50 = vector.shape_cast %49 : vector<1x8x128xf32> to vector<8x128xf32>
    %51 = vector.shape_cast %47 : vector<8x128xf32> to vector<1x8x128xf32>
    tpu.vector_store %arg3[%48, %c0_43, %c0_44], %51 {strides = array<i32>} : memref<8x8x128xf32, #tpu.memory_space<vmem>>, vector<1x8x128xf32>,
    %c0_45 = arith.constant 0 : index
    %c0_46 = arith.constant 0 : index
    %52 = vector.load %arg4[%c0_45, %c0_46] : memref<8x128xf32, #tpu.memory_space<vmem>>, vector<8x128xf32>
    %53 = arith.index_cast %c4_i32 : i32 to index
    %c0_47 = arith.constant 0 : index
    %c0_48 = arith.constant 0 : index
    %54 = vector.load %arg2[%53, %c0_47, %c0_48] : memref<8x8x128xf32, #tpu.memory_space<vmem>>, vector<1x8x128xf32>
    %55 = vector.shape_cast %54 : vector<1x8x128xf32> to vector<8x128xf32>
    %56 = arith.addf %52, %55 : vector<8x128xf32>
    %c0_49 = arith.constant 0 : index
    %c0_50 = arith.constant 0 : index
    %57 = vector.load %arg4[%c0_49, %c0_50] : memref<8x128xf32, #tpu.memory_space<vmem>>, vector<8x128xf32>
    tpu.vector_store %arg4[%c0_49, %c0_50], %56 {strides = array<i32>} : memref<8x128xf32, #tpu.memory_space<vmem>>, vector<8x128xf32>,
    %c5_i32 = arith.constant 5 : i32
    %c0_51 = arith.constant 0 : index
    %c0_52 = arith.constant 0 : index
    %58 = vector.load %arg4[%c0_51, %c0_52] : memref<8x128xf32, #tpu.memory_space<vmem>>, vector<8x128xf32>
    %59 = arith.index_cast %c5_i32 : i32 to index
    %c0_53 = arith.constant 0 : index
    %c0_54 = arith.constant 0 : index
    %60 = vector.load %arg3[%59, %c0_53, %c0_54] : memref<8x8x128xf32, #tpu.memory_space<vmem>>, vector<1x8x128xf32>
    %61 = vector.shape_cast %60 : vector<1x8x128xf32> to vector<8x128xf32>
    %62 = vector.shape_cast %58 : vector<8x128xf32> to vector<1x8x128xf32>
    tpu.vector_store %arg3[%59, %c0_53, %c0_54], %62 {strides = array<i32>} : memref<8x8x128xf32, #tpu.memory_space<vmem>>, vector<1x8x128xf32>,
    %c0_55 = arith.constant 0 : index
    %c0_56 = arith.constant 0 : index
    %63 = vector.load %arg4[%c0_55, %c0_56] : memref<8x128xf32, #tpu.memory_space<vmem>>, vector<8x128xf32>
    %64 = arith.index_cast %c5_i32 : i32 to index
    %c0_57 = arith.constant 0 : index
    %c0_58 = arith.constant 0 : index
    %65 = vector.load %arg2[%64, %c0_57, %c0_58] : memref<8x8x128xf32, #tpu.memory_space<vmem>>, vector<1x8x128xf32>
    %66 = vector.shape_cast %65 : vector<1x8x128xf32> to vector<8x128xf32>
    %67 = arith.addf %63, %66 : vector<8x128xf32>
    %c0_59 = arith.constant 0 : index
    %c0_60 = arith.constant 0 : index
    %68 = vector.load %arg4[%c0_59, %c0_60] : memref<8x128xf32, #tpu.memory_space<vmem>>, vector<8x128xf32>
    tpu.vector_store %arg4[%c0_59, %c0_60], %67 {strides = array<i32>} : memref<8x128xf32, #tpu.memory_space<vmem>>, vector<8x128xf32>,
    %c6_i32 = arith.constant 6 : i32
    %c0_61 = arith.constant 0 : index
    %c0_62 = arith.constant 0 : index
    %69 = vector.load %arg4[%c0_61, %c0_62] : memref<8x128xf32, #tpu.memory_space<vmem>>, vector<8x128xf32>
    %70 = arith.index_cast %c6_i32 : i32 to index
    %c0_63 = arith.constant 0 : index
    %c0_64 = arith.constant 0 : index
    %71 = vector.load %arg3[%70, %c0_63, %c0_64] : memref<8x8x128xf32, #tpu.memory_space<vmem>>, vector<1x8x128xf32>
    %72 = vector.shape_cast %71 : vector<1x8x128xf32> to vector<8x128xf32>
    %73 = vector.shape_cast %69 : vector<8x128xf32> to vector<1x8x128xf32>
    tpu.vector_store %arg3[%70, %c0_63, %c0_64], %73 {strides = array<i32>} : memref<8x8x128xf32, #tpu.memory_space<vmem>>, vector<1x8x128xf32>,
    %c0_65 = arith.constant 0 : index
    %c0_66 = arith.constant 0 : index
    %74 = vector.load %arg4[%c0_65, %c0_66] : memref<8x128xf32, #tpu.memory_space<vmem>>, vector<8x128xf32>
    %75 = arith.index_cast %c6_i32 : i32 to index
    %c0_67 = arith.constant 0 : index
    %c0_68 = arith.constant 0 : index
    %76 = vector.load %arg2[%75, %c0_67, %c0_68] : memref<8x8x128xf32, #tpu.memory_space<vmem>>, vector<1x8x128xf32>
    %77 = vector.shape_cast %76 : vector<1x8x128xf32> to vector<8x128xf32>
    %78 = arith.addf %74, %77 : vector<8x128xf32>
    %c0_69 = arith.constant 0 : index
    %c0_70 = arith.constant 0 : index
    %79 = vector.load %arg4[%c0_69, %c0_70] : memref<8x128xf32, #tpu.memory_space<vmem>>, vector<8x128xf32>
    tpu.vector_store %arg4[%c0_69, %c0_70], %78 {strides = array<i32>} : memref<8x128xf32, #tpu.memory_space<vmem>>, vector<8x128xf32>,
    %c7_i32 = arith.constant 7 : i32
    %c0_71 = arith.constant 0 : index
    %c0_72 = arith.constant 0 : index
    %80 = vector.load %arg4[%c0_71, %c0_72] : memref<8x128xf32, #tpu.memory_space<vmem>>, vector<8x128xf32>
    %81 = arith.index_cast %c7_i32 : i32 to index
    %c0_73 = arith.constant 0 : index
    %c0_74 = arith.constant 0 : index
    %82 = vector.load %arg3[%81, %c0_73, %c0_74] : memref<8x8x128xf32, #tpu.memory_space<vmem>>, vector<1x8x128xf32>
    %83 = vector.shape_cast %82 : vector<1x8x128xf32> to vector<8x128xf32>
    %84 = vector.shape_cast %80 : vector<8x128xf32> to vector<1x8x128xf32>
    tpu.vector_store %arg3[%81, %c0_73, %c0_74], %84 {strides = array<i32>} : memref<8x8x128xf32, #tpu.memory_space<vmem>>, vector<1x8x128xf32>,
    %c0_75 = arith.constant 0 : index
    %c0_76 = arith.constant 0 : index
    %85 = vector.load %arg4[%c0_75, %c0_76] : memref<8x128xf32, #tpu.memory_space<vmem>>, vector<8x128xf32>
    %86 = arith.index_cast %c7_i32 : i32 to index
    %c0_77 = arith.constant 0 : index
    %c0_78 = arith.constant 0 : index
    %87 = vector.load %arg2[%86, %c0_77, %c0_78] : memref<8x8x128xf32, #tpu.memory_space<vmem>>, vector<1x8x128xf32>
    %88 = vector.shape_cast %87 : vector<1x8x128xf32> to vector<8x128xf32>
    %89 = arith.addf %85, %88 : vector<8x128xf32>
    %c0_79 = arith.constant 0 : index
    %c0_80 = arith.constant 0 : index
    %90 = vector.load %arg4[%c0_79, %c0_80] : memref<8x128xf32, #tpu.memory_space<vmem>>, vector<8x128xf32>
    tpu.vector_store %arg4[%c0_79, %c0_80], %89 {strides = array<i32>} : memref<8x128xf32, #tpu.memory_space<vmem>>, vector<8x128xf32>,
    %c8_i32 = arith.constant 8 : i32
    return
  }
  func.func @transform_0(%arg0: i32, %arg1: i32) -> (i32, i32, i32) {
    %c0_i32 = arith.constant 0 : i32
    %c0_i32_0 = arith.constant 0 : i32
    return %arg1, %arg0, %c0_i32 : i32, i32, i32
  }
  func.func @transform_1(%arg0: i32, %arg1: i32) -> (i32, i32, i32) {
    %c0_i32 = arith.constant 0 : i32
    %c0_i32_0 = arith.constant 0 : i32
    return %arg1, %arg0, %c0_i32 : i32, i32, i32
  }
}

</mosaic_0001>

<bundles_post_ra>
// kernel: summ.1
= control target key start
LH: loop header
LB: loop body
LE: loop exit
PB: predicated region body
PF: predicated region fallthrough
CT: control target
= control target key end

     0   :  { %v94_v0 = vmov 0.0   ;;  %s150_s1 = inlined_call_operand.vmem [shape: f32[8,8,128], index: 1, kind: output, shape index: {}]   ;;  %s151_s0 = inlined_call_operand.vmem [shape: f32[8,8,128], index: 0, kind: input, shape index: {}]  }
   0x1   :  { %14 = vst [vmem:[%s150_s1] sm:$0xff] %v94_v0  ;;  %v16_v1 = vld [vmem:[%s151_s0] sm:$0xff]  ;;  %v80_v2 = vld [vmem:[%s151_s0 + $0x8] sm:$0xff]  ;;  %v82_v3 = vld [vmem:[%s151_s0 + $0x10] sm:$0xff] }
   0x2   :  { %79 = vst [vmem:[%s150_s1 + $0x8] sm:$0xff] %v16_v1  ;;  %v25_v4 = vadd.f32 %v80_v2, %v16_v1  ;;  %v84_v5 = vld [vmem:[%s151_s0 + $0x18] sm:$0xff]  ;;  %v86_v7 = vld [vmem:[%s151_s0 + $0x20] sm:$0xff]  ;;  %v88_v9 = vld [vmem:[%s151_s0 + $0x28] sm:$0xff] }
   0x3   :  { %v90_v11 = vld [vmem:[%s151_s0 + $0x30] sm:$0xff] }
   0x4   :  { %81 = vst [vmem:[%s150_s1 + $0x10] sm:$0xff] %v25_v4  ;;  %v33_v6 = vadd.f32 %v82_v3, %v25_v4 }
   0x6   :  { %83 = vst [vmem:[%s150_s1 + $0x18] sm:$0xff] %v33_v6  ;;  %v41_v8 = vadd.f32 %v84_v5, %v33_v6 }
   0x8   :  { %85 = vst [vmem:[%s150_s1 + $0x20] sm:$0xff] %v41_v8  ;;  %v49_v10 = vadd.f32 %v86_v7, %v41_v8 }
   0xa   :  { %87 = vst [vmem:[%s150_s1 + $0x28] sm:$0xff] %v49_v10  ;;  %v57_v12 = vadd.f32 %v88_v9, %v49_v10 }
   0xc   :  { %89 = vst [vmem:[%s150_s1 + $0x30] sm:$0xff] %v57_v12  ;;  %v65_v13 = vadd.f32 %v90_v11, %v57_v12 }
   0xe   :  { %91 = vst [vmem:[%s150_s1 + $0x38] sm:$0xff] %v65_v13 }

</bundles_post_ra>
